<compile_context>
chip_gen: v5e
topology: v5e:2x2
jax: 0.10.0
libtpu: 0.0.40
codegen_flags: <defaults>
</compile_context>

<pallas_src>
import math
import functools

import jax
import jax.numpy as jnp
from jax.experimental import pallas as pl
from jax.experimental.pallas import tpu as pltpu


MXU_DTYPE = jnp.bfloat16            # matmul operand dtype (f32 accumulation)
VMEM_LIMIT = 64 * 1024 * 1024       # explicit scoped-VMEM budget (fits v7x)
MAX_ROW_TILE = 256                  # row-tile target for flattened [N, D] slabs
LN_EPS = 1e-5


def _round_up(x, m):
    return ((x + m - 1) // m) * m


def _row_tiles(n):
    """Pick a row tile (multiple of 8, capped at MAX_ROW_TILE) and the padded N."""
    tm = MAX_ROW_TILE if n >= MAX_ROW_TILE else _round_up(n, 8)
    return tm, _round_up(n, tm)


def _compiler_params(n_axes):
    return pltpu.CompilerParams(
        dimension_semantics=("parallel",) * n_axes,
        vmem_limit_bytes=VMEM_LIMIT)


# ------------------------- in-kernel helper math (f32) -------------------------

def _layernorm(y, g, b):
    mu = jnp.mean(y, axis=-1, keepdims=True)
    yc = y - mu
    var = jnp.mean(yc * yc, axis=-1, keepdims=True)
    return yc * jax.lax.rsqrt(var + LN_EPS) * g + b


def _softmax_rows(s):
    s = s - jnp.max(s, axis=-1, keepdims=True)
    p = jnp.exp(s)
    return p * pl.reciprocal(jnp.sum(p, axis=-1, keepdims=True), approx=True)


# ----------------------------- Pallas kernels -----------------------------

def _attn_block_kernel(xq_ref, xkv_ref, mask_ref,
                       wq_ref, bq_ref, wkv_ref, bkv_ref, wo_ref, bo_ref,
                       g_ref, b_ref, o_ref, *, nhead, scale):
    # One batch element per grid step: fused QKV proj + multi-head attention +
    # output proj + residual + LayerNorm (post-norm, eval => dropout identity).
    xq = xq_ref[0]                               # [Sq, D] f32 (also the residual)
    xkv = xkv_ref[0]                             # [Sk, D]
    D = xq.shape[-1]
    dh = D // nhead

    q = jnp.dot(xq.astype(MXU_DTYPE), wq_ref[...],
                preferred_element_type=jnp.float32) + bq_ref[...]       # [Sq, D]
    kv = jnp.dot(xkv.astype(MXU_DTYPE), wkv_ref[...],
                 preferred_element_type=jnp.float32) + bkv_ref[...]     # [Sk, 2D]
    k = kv[:, :D]
    v = kv[:, D:]

    mask = mask_ref[...]
    heads = []
    for h in range(nhead):                       # static head split (lane slices)
        qh = q[:, h * dh:(h + 1) * dh]
        kh = k[:, h * dh:(h + 1) * dh]
        vh = v[:, h * dh:(h + 1) * dh]
        # contract the Dh axis of q against the Dh axis of k (no explicit k.T)
        s = jax.lax.dot_general(qh, kh, (((1,), (1,)), ((), ())),
                                preferred_element_type=jnp.float32)
        p = _softmax_rows(s * scale + mask)
        heads.append(jnp.dot(p, vh, preferred_element_type=jnp.float32))
    attn = jnp.concatenate(heads, axis=-1)                               # [Sq, D]

    proj = jnp.dot(attn.astype(MXU_DTYPE), wo_ref[...],
                   preferred_element_type=jnp.float32) + bo_ref[...]
    o_ref[0] = _layernorm(xq + proj, g_ref[...], b_ref[...])


def _ffn_block_kernel(x_ref, w1_ref, b1_ref, w2_ref, b2_ref, g_ref, b_ref, o_ref):
    # Fused: linear1 -> squared_relu -> linear2 -> residual add -> LayerNorm
    x = x_ref[...]                                                       # [TM, D]
    h = jnp.dot(x.astype(MXU_DTYPE), w1_ref[...],
                preferred_element_type=jnp.float32) + b1_ref[...]
    h = jnp.maximum(h, 0.0)
    h = h * h                                                            # squared_relu
    y = jnp.dot(h.astype(MXU_DTYPE), w2_ref[...],
                preferred_element_type=jnp.float32) + b2_ref[...]
    o_ref[...] = _layernorm(x + y, g_ref[...], b_ref[...])


def _mos_head_kernel(x_ref, wp_ref, wl_ref, bl_ref, wd_ref, bd_ref, o_ref,
                     *, n_experts, d_model):
    # Fused mixture-of-softmaxes decoder head for one row tile:
    #   prior softmax, tanh latent, per-expert decoder matmul + vocab softmax,
    #   mixture, log.  No [E, N, V] tensor ever hits HBM.
    x = x_ref[...].astype(MXU_DTYPE)                                     # [TM, D]
    prior = _softmax_rows(jnp.dot(x, wp_ref[...],
                                  preferred_element_type=jnp.float32))   # [TM, E]
    latent = jnp.tanh(jnp.dot(x, wl_ref[...],
                              preferred_element_type=jnp.float32)
                      + bl_ref[...])                                     # [TM, E*D]
    wd = wd_ref[...]                                                     # [D, V] (resident)
    bd = bd_ref[...]                                                     # [1, V]
    acc = jnp.zeros(o_ref.shape, jnp.float32)
    for e in range(n_experts):
        le = latent[:, e * d_model:(e + 1) * d_model].astype(MXU_DTYPE)
        p = _softmax_rows(jnp.dot(le, wd,
                                  preferred_element_type=jnp.float32) + bd)
        acc = acc + prior[:, e:e + 1] * p
    o_ref[...] = jnp.log(acc + 1e-8)
    # TODO(synk): for production vocab sizes (V ~ 50k) the V axis should be
    # tiled with an online-softmax accumulation; full-V tiles are fine here.


# ----------------------------- kernel wrappers -----------------------------

def attn_block(xq, xkv, ap, ln_g, ln_b, mask, nhead):
    # xq, xkv: [B, S, D] f32.  One fused pallas_call, grid over batch.
    B, Sq, D = xq.shape
    Sk = xkv.shape[1]
    scale = 1.0 / math.sqrt(D // nhead)
    kern = functools.partial(_attn_block_kernel, nhead=nhead, scale=scale)
    const = lambda i: (0, 0)
    return pl.pallas_call(
        kern,
        out_shape=jax.ShapeDtypeStruct((B, Sq, D), jnp.float32),
        grid=(B,),
        in_specs=[pl.BlockSpec((1, Sq, D), lambda i: (i, 0, 0)),
                  pl.BlockSpec((1, Sk, D), lambda i: (i, 0, 0)),
                  pl.BlockSpec((Sq, Sk), const),
                  pl.BlockSpec((D, D), const),        # wq   (resident)
                  pl.BlockSpec((1, D), const),        # bq
                  pl.BlockSpec((D, 2 * D), const),    # wkv  (resident)
                  pl.BlockSpec((1, 2 * D), const),    # bkv
                  pl.BlockSpec((D, D), const),        # wo   (resident)
                  pl.BlockSpec((1, D), const),        # bo
                  pl.BlockSpec((1, D), const),        # ln gamma
                  pl.BlockSpec((1, D), const)],       # ln beta
        out_specs=pl.BlockSpec((1, Sq, D), lambda i: (i, 0, 0)),
        compiler_params=_compiler_params(1),
    )(xq, xkv, mask, ap['wq'], ap['bq'], ap['wkv'], ap['bkv'],
      ap['wo'], ap['bo'], ln_g, ln_b)


def ffn_block(x_bsd, w1, b1, w2, b2, ln_g, ln_b):
    B, S, D = x_bsd.shape
    F = w1.shape[1]
    N = B * S
    tm, n_pad = _row_tiles(N)
    x = x_bsd.reshape(N, D)
    if n_pad != N:
        x = jnp.pad(x, ((0, n_pad - N), (0, 0)))
    const = lambda i: (0, 0)
    y = pl.pallas_call(
        _ffn_block_kernel,
        out_shape=jax.ShapeDtypeStruct((n_pad, D), jnp.float32),
        grid=(n_pad // tm,),
        in_specs=[pl.BlockSpec((tm, D), lambda i: (i, 0)),
                  pl.BlockSpec((D, F), const),        # w1 (resident)
                  pl.BlockSpec((1, F), const),
                  pl.BlockSpec((F, D), const),        # w2 (resident)
                  pl.BlockSpec((1, D), const),
                  pl.BlockSpec((1, D), const),
                  pl.BlockSpec((1, D), const)],
        out_specs=pl.BlockSpec((tm, D), lambda i: (i, 0)),
        compiler_params=_compiler_params(1),
    )(x, w1, b1, w2, b2, ln_g, ln_b)
    if n_pad != N:
        y = y[:N]
    return y.reshape(B, S, D)


def mos_head(x_bsd, params, n_experts):
    B, S, D = x_bsd.shape
    V = params['w_dec'].shape[1]
    E = n_experts
    N = B * S
    tm, n_pad = _row_tiles(N)
    x = x_bsd.reshape(N, D)
    if n_pad != N:
        x = jnp.pad(x, ((0, n_pad - N), (0, 0)))
    const = lambda i: (0, 0)
    kern = functools.partial(_mos_head_kernel, n_experts=E, d_model=D)
    y = pl.pallas_call(
        kern,
        out_shape=jax.ShapeDtypeStruct((n_pad, V), jnp.float32),
        grid=(n_pad // tm,),
        in_specs=[pl.BlockSpec((tm, D), lambda i: (i, 0)),
                  pl.BlockSpec((D, E), const),        # w_prior  (resident)
                  pl.BlockSpec((D, E * D), const),    # w_latent (resident)
                  pl.BlockSpec((1, E * D), const),
                  pl.BlockSpec((D, V), const),        # w_dec    (resident)
                  pl.BlockSpec((1, V), const)],
        out_specs=pl.BlockSpec((tm, V), lambda i: (i, 0)),
        compiler_params=_compiler_params(1),
    )(x, params['w_prior'], params['w_latent'], params['b_latent'],
      params['w_dec'], params['b_dec'])
    if n_pad != N:
        y = y[:N]
    return y.reshape(B, S, V)


# ----------------------------- model glue -----------------------------

def encoder_layer(x, p, mask, nhead):
    # post-norm TransformerEncoderLayer with squared_relu FFN (eval mode)
    x = attn_block(x, x, p['self_attn'], p['ln1_g'], p['ln1_b'], mask, nhead)
    x = ffn_block(x, p['w1'], p['b1'], p['w2'], p['b2'], p['ln2_g'], p['ln2_b'])
    return x


def decoder_layer(x, mem, p, mask, nhead):
    # post-norm TransformerDecoderLayer; the reference forward explicitly passes
    # memory_mask=src_mask, so cross-attention uses the same mask as self-attn.
    x = attn_block(x, x, p['self_attn'], p['ln1_g'], p['ln1_b'], mask, nhead)
    x = attn_block(x, mem, p['cross_attn'], p['ln2_g'], p['ln2_b'], mask, nhead)
    x = ffn_block(x, p['w1'], p['b1'], p['w2'], p['b2'], p['ln3_g'], p['ln3_b'])
    return x


def positional_encoding(S, D):
    position = jnp.arange(S, dtype=jnp.float32)[:, None]
    div_term = jnp.exp(jnp.arange(0, D, 2, dtype=jnp.float32) * (-math.log(10000.0) / D))
    pe = jnp.zeros((S, 1, D), jnp.float32)
    pe = pe.at[:, 0, 0::2].set(jnp.sin(position * div_term))
    pe = pe.at[:, 0, 1::2].set(jnp.cos(position * div_term))
    return pe


def utransformer_forward(params, src_tokens, src_mask, nhead, n_experts):
    S, B = src_tokens.shape
    D = params['embedding'].shape[1]

    # embedding gather kept in plain JAX + sinusoidal positional encoding
    x = jnp.take(params['embedding'], src_tokens, axis=0)          # [S, B, D]
    x = x + positional_encoding(S, D)

    # internal layout is batch-major [B, S, D] (lane-dense per-batch tiles)
    x = x.transpose(1, 0, 2)

    encoder_outputs = []
    hidden_states = []
    for p in params['enc_layers']:
        x = encoder_layer(x, p, src_mask, nhead)
        encoder_outputs.append(x)
        hidden_states.append(x.transpose(1, 0, 2))                 # [S, B, D]

    out = x
    for p in params['dec_layers']:
        mem = encoder_outputs.pop()                                # U-net skip (reverse)
        out = decoder_layer(out, mem, p, src_mask, nhead)
        hidden_states.append(out.transpose(1, 0, 2))

    logp = mos_head(out, params, n_experts)                        # [B, S, V]
    return logp.transpose(1, 0, 2), hidden_states                  # [S, B, V]


# ----------------------------- parameter init -----------------------------

def init_params(key, ntokens, d_model, nhead, dim_ff, nlayers, n_experts):
    keys = iter(jax.random.split(key, 512))
    nk = lambda: next(keys)

    def kaiming_t(din, dout):
        # kaiming_normal_(fan_in, relu) on a [dout, din] torch weight,
        # returned pre-transposed as [din, dout] and stored bf16 for the MXU.
        w = jax.random.normal(nk(), (din, dout), jnp.float32) * math.sqrt(2.0 / din)
        return w.astype(MXU_DTYPE)

    def lin(din, dout, bias=0.01):
        return kaiming_t(din, dout), jnp.full((1, dout), bias, jnp.float32)

    def attn_params():
        wq, bq = lin(d_model, d_model, 0.0)
        wk, bk = lin(d_model, d_model, 0.0)
        wv, bv = lin(d_model, d_model, 0.0)
        wo, bo = lin(d_model, d_model, 0.01)
        return dict(wq=wq, bq=bq,
                    wkv=jnp.concatenate([wk, wv], axis=1),
                    bkv=jnp.concatenate([bk, bv], axis=1),
                    wo=wo, bo=bo)

    def ln_params():
        return (jnp.ones((1, d_model), jnp.float32),
                jnp.zeros((1, d_model), jnp.float32))

    def enc_layer_params():
        w1, b1 = lin(d_model, dim_ff)
        w2, b2 = lin(dim_ff, d_model)
        g1, bb1 = ln_params()
        g2, bb2 = ln_params()
        return dict(self_attn=attn_params(), w1=w1, b1=b1, w2=w2, b2=b2,
                    ln1_g=g1, ln1_b=bb1, ln2_g=g2, ln2_b=bb2)

    def dec_layer_params():
        w1, b1 = lin(d_model, dim_ff)
        w2, b2 = lin(dim_ff, d_model)
        g1, bb1 = ln_params()
        g2, bb2 = ln_params()
        g3, bb3 = ln_params()
        return dict(self_attn=attn_params(), cross_attn=attn_params(),
                    w1=w1, b1=b1, w2=w2, b2=b2,
                    ln1_g=g1, ln1_b=bb1, ln2_g=g2, ln2_b=bb2, ln3_g=g3, ln3_b=bb3)

    w_dec, b_dec = lin(d_model, ntokens)
    w_latent, b_latent = lin(d_model, n_experts * d_model)
    params = dict(
        embedding=jax.random.normal(nk(), (ntokens, d_model), jnp.float32) * 0.1,
        enc_layers=[enc_layer_params() for _ in range(nlayers)],
        dec_layers=[dec_layer_params() for _ in range(nlayers)],
        w_dec=w_dec, b_dec=b_dec,
        w_prior=kaiming_t(d_model, n_experts),                 # prior has no bias
        w_latent=w_latent, b_latent=b_latent,
    )
    return params


# ----------------------------- main -----------------------------

if __name__ == "__main__":
    S, B = 8, 2
    ntokens, d_model, nhead, dim_ff, nlayers, n_experts = 64, 32, 4, 64, 2, 3

    key = jax.random.PRNGKey(0)
    k_params, k_tok = jax.random.split(key)
    params = init_params(k_params, ntokens, d_model, nhead, dim_ff, nlayers, n_experts)

    src = jax.random.randint(k_tok, (S, B), 0, ntokens, dtype=jnp.int32)
    idx = jnp.arange(S)
    src_mask = jnp.where(idx[:, None] >= idx[None, :], 0.0, -1e9).astype(jnp.float32)

    out, hidden_states = utransformer_forward(params, src, src_mask, nhead, n_experts)
    out = jax.block_until_ready(out)

    assert out.shape == (S, B, ntokens), out.shape
    assert len(hidden_states) == 2 * nlayers
    assert bool(jnp.all(jnp.isfinite(out)))
    # TODO(synk): dropout / adversarial-training / GRU / aux-head / weighted-
    # connection branches are training-only or disabled by default flags and are
    # not executed in eval.
    print("KERNEL_OK")
</pallas_src>

<mosaic_0001>
module attributes {stable_mosaic.version = 11 : i64} {
  func.func @_attn_block_kernel(%arg0: i32, %arg1: memref<1x8x32xf32, #tpu.memory_space<vmem>>, %arg2: memref<1x8x32xf32, #tpu.memory_space<vmem>>, %arg3: memref<8x8xf32, #tpu.memory_space<vmem>>, %arg4: memref<32x32xbf16, #tpu.memory_space<vmem>>, %arg5: memref<1x32xf32, #tpu.memory_space<vmem>>, %arg6: memref<32x64xbf16, #tpu.memory_space<vmem>>, %arg7: memref<1x64xf32, #tpu.memory_space<vmem>>, %arg8: memref<32x32xbf16, #tpu.memory_space<vmem>>, %arg9: memref<1x32xf32, #tpu.memory_space<vmem>>, %arg10: memref<1x32xf32, #tpu.memory_space<vmem>>, %arg11: memref<1x32xf32, #tpu.memory_space<vmem>>, %arg12: memref<1x8x32xf32, #tpu.memory_space<vmem>>) attributes {dimension_semantics = [#tpu.dimension_semantics<parallel>], iteration_bounds = array<i64: 2>, scalar_prefetch = 0 : i64, scratch_operands = 0 : i64, tpu.core_type = #tpu.core_type<tc>, window_params = [{transform_indices = @transform_0, window_bounds = array<i64: 1, 8, 32>}, {transform_indices = @transform_1, window_bounds = array<i64: 1, 8, 32>}, {pipeline_mode = #tpu.pipeline_mode<synchronous>, transform_indices = @transform_2, window_bounds = array<i64: 8, 8>}, {pipeline_mode = #tpu.pipeline_mode<synchronous>, transform_indices = @transform_3, window_bounds = array<i64: 32, 32>}, {pipeline_mode = #tpu.pipeline_mode<synchronous>, transform_indices = @transform_4, window_bounds = array<i64: 1, 32>}, {pipeline_mode = #tpu.pipeline_mode<synchronous>, transform_indices = @transform_5, window_bounds = array<i64: 32, 64>}, {pipeline_mode = #tpu.pipeline_mode<synchronous>, transform_indices = @transform_6, window_bounds = array<i64: 1, 64>}, {pipeline_mode = #tpu.pipeline_mode<synchronous>, transform_indices = @transform_7, window_bounds = array<i64: 32, 32>}, {pipeline_mode = #tpu.pipeline_mode<synchronous>, transform_indices = @transform_8, window_bounds = array<i64: 1, 32>}, {pipeline_mode = #tpu.pipeline_mode<synchronous>, transform_indices = @transform_9, window_bounds = array<i64: 1, 32>}, {pipeline_mode = #tpu.pipeline_mode<synchronous>, transform_indices = @transform_10, window_bounds = array<i64: 1, 32>}, {transform_indices = @transform_11, window_bounds = array<i64: 1, 8, 32>}]} {
    %c0 = arith.constant 0 : index
    %c0_0 = arith.constant 0 : index
    %c0_1 = arith.constant 0 : index
    %0 = vector.load %arg1[%c0, %c0_0, %c0_1] : memref<1x8x32xf32, #tpu.memory_space<vmem>>, vector<1x8x32xf32>
    %1 = vector.shape_cast %0 : vector<1x8x32xf32> to vector<8x32xf32>
    %c0_2 = arith.constant 0 : index
    %c0_3 = arith.constant 0 : index
    %c0_4 = arith.constant 0 : index
    %2 = vector.load %arg2[%c0_2, %c0_3, %c0_4] : memref<1x8x32xf32, #tpu.memory_space<vmem>>, vector<1x8x32xf32>
    %3 = vector.shape_cast %2 : vector<1x8x32xf32> to vector<8x32xf32>
    %4 = arith.truncf %1 : vector<8x32xf32> to vector<8x32xbf16>
    %c0_5 = arith.constant 0 : index
    %c0_6 = arith.constant 0 : index
    %5 = vector.load %arg4[%c0_5, %c0_6] : memref<32x32xbf16, #tpu.memory_space<vmem>>, vector<32x32xbf16>
    %cst = arith.constant dense<0.000000e+00> : vector<8x32xf32>
    %6 = tpu.matmul %4, %5, %cst {dimension_numbers = #tpu.dot_dimension_numbers<[1], [0], [0], [1], [0, 0, 1, 1], [], []>} : vector<8x32xbf16>, vector<32x32xbf16>, vector<8x32xf32> -> vector<8x32xf32>
    %c0_7 = arith.constant 0 : index
    %c0_8 = arith.constant 0 : index
    %7 = vector.load %arg5[%c0_7, %c0_8] : memref<1x32xf32, #tpu.memory_space<vmem>>, vector<1x32xf32>
    %8 = vector.broadcast %7 : vector<1x32xf32> to vector<8x32xf32>
    %9 = arith.addf %6, %8 : vector<8x32xf32>
    %10 = arith.truncf %3 : vector<8x32xf32> to vector<8x32xbf16>
    %c0_9 = arith.constant 0 : index
    %c0_10 = arith.constant 0 : index
    %11 = vector.load %arg6[%c0_9, %c0_10] : memref<32x64xbf16, #tpu.memory_space<vmem>>, vector<32x64xbf16>
    %cst_11 = arith.constant dense<0.000000e+00> : vector<8x64xf32>
    %12 = tpu.matmul %10, %11, %cst_11 {dimension_numbers = #tpu.dot_dimension_numbers<[1], [0], [0], [1], [0, 0, 1, 1], [], []>} : vector<8x32xbf16>, vector<32x64xbf16>, vector<8x64xf32> -> vector<8x64xf32>
    %c0_12 = arith.constant 0 : index
    %c0_13 = arith.constant 0 : index
    %13 = vector.load %arg7[%c0_12, %c0_13] : memref<1x64xf32, #tpu.memory_space<vmem>>, vector<1x64xf32>
    %14 = vector.broadcast %13 : vector<1x64xf32> to vector<8x64xf32>
    %15 = arith.addf %12, %14 : vector<8x64xf32>
    %16 = vector.extract_strided_slice %15 {offsets = [0, 0], sizes = [8, 32], strides = [1, 1]} : vector<8x64xf32> to vector<8x32xf32>
    %17 = vector.extract_strided_slice %15 {offsets = [0, 32], sizes = [8, 32], strides = [1, 1]} : vector<8x64xf32> to vector<8x32xf32>
    %c0_14 = arith.constant 0 : index
    %c0_15 = arith.constant 0 : index
    %18 = vector.load %arg3[%c0_14, %c0_15] : memref<8x8xf32, #tpu.memory_space<vmem>>, vector<8x8xf32>
    %19 = vector.extract_strided_slice %9 {offsets = [0, 0], sizes = [8, 8], strides = [1, 1]} : vector<8x32xf32> to vector<8x8xf32>
    %20 = vector.extract_strided_slice %16 {offsets = [0, 0], sizes = [8, 8], strides = [1, 1]} : vector<8x32xf32> to vector<8x8xf32>
    %21 = vector.extract_strided_slice %17 {offsets = [0, 0], sizes = [8, 8], strides = [1, 1]} : vector<8x32xf32> to vector<8x8xf32>
    %cst_16 = arith.constant dense<0.000000e+00> : vector<8x8xf32>
    %22 = tpu.matmul %19, %20, %cst_16 {dimension_numbers = #tpu.dot_dimension_numbers<[1], [1], [0], [0], [0, 0, 1, 0], [], []>} : vector<8x8xf32>, vector<8x8xf32>, vector<8x8xf32> -> vector<8x8xf32>
    %cst_17 = arith.constant 0.353553385 : f32
    %23 = vector.broadcast %cst_17 : f32 to vector<8x8xf32>
    %24 = arith.mulf %22, %23 : vector<8x8xf32>
    %25 = arith.addf %24, %18 : vector<8x8xf32>
    %cst_18 = arith.constant dense<0xFF800000> : vector<8xf32>
    %26 = vector.multi_reduction <maximumf>, %25, %cst_18 [1] : vector<8x8xf32> to vector<8xf32>
    %27 = vector.shape_cast %26 : vector<8xf32> to vector<8x1xf32>
    %28 = vector.broadcast %27 : vector<8x1xf32> to vector<8x8xf32>
    %29 = arith.subf %25, %28 : vector<8x8xf32>
    %30 = math.exp %29 : vector<8x8xf32>
    %cst_19 = arith.constant dense<0.000000e+00> : vector<8xf32>
    %31 = vector.multi_reduction <add>, %30, %cst_19 [1] : vector<8x8xf32> to vector<8xf32>
    %32 = vector.shape_cast %31 : vector<8xf32> to vector<8x1xf32>
    %33 = tpu.reciprocal %32 {approx = true} : vector<8x1xf32> -> vector<8x1xf32>
    %34 = vector.broadcast %33 : vector<8x1xf32> to vector<8x8xf32>
    %35 = arith.mulf %30, %34 : vector<8x8xf32>
    %cst_20 = arith.constant dense<0.000000e+00> : vector<8x8xf32>
    %36 = tpu.matmul %35, %21, %cst_20 {dimension_numbers = #tpu.dot_dimension_numbers<[1], [0], [0], [1], [0, 0, 1, 1], [], []>} : vector<8x8xf32>, vector<8x8xf32>, vector<8x8xf32> -> vector<8x8xf32>
    %37 = vector.extract_strided_slice %9 {offsets = [0, 8], sizes = [8, 8], strides = [1, 1]} : vector<8x32xf32> to vector<8x8xf32>
    %38 = vector.extract_strided_slice %16 {offsets = [0, 8], sizes = [8, 8], strides = [1, 1]} : vector<8x32xf32> to vector<8x8xf32>
    %39 = vector.extract_strided_slice %17 {offsets = [0, 8], sizes = [8, 8], strides = [1, 1]} : vector<8x32xf32> to vector<8x8xf32>
    %cst_21 = arith.constant dense<0.000000e+00> : vector<8x8xf32>
    %40 = tpu.matmul %37, %38, %cst_21 {dimension_numbers = #tpu.dot_dimension_numbers<[1], [1], [0], [0], [0, 0, 1, 0], [], []>} : vector<8x8xf32>, vector<8x8xf32>, vector<8x8xf32> -> vector<8x8xf32>
    %cst_22 = arith.constant 0.353553385 : f32
    %41 = vector.broadcast %cst_22 : f32 to vector<8x8xf32>
    %42 = arith.mulf %40, %41 : vector<8x8xf32>
    %43 = arith.addf %42, %18 : vector<8x8xf32>
    %cst_23 = arith.constant dense<0xFF800000> : vector<8xf32>
    %44 = vector.multi_reduction <maximumf>, %43, %cst_23 [1] : vector<8x8xf32> to vector<8xf32>
    %45 = vector.shape_cast %44 : vector<8xf32> to vector<8x1xf32>
    %46 = vector.broadcast %45 : vector<8x1xf32> to vector<8x8xf32>
    %47 = arith.subf %43, %46 : vector<8x8xf32>
    %48 = math.exp %47 : vector<8x8xf32>
    %cst_24 = arith.constant dense<0.000000e+00> : vector<8xf32>
    %49 = vector.multi_reduction <add>, %48, %cst_24 [1] : vector<8x8xf32> to vector<8xf32>
    %50 = vector.shape_cast %49 : vector<8xf32> to vector<8x1xf32>
    %51 = tpu.reciprocal %50 {approx = true} : vector<8x1xf32> -> vector<8x1xf32>
    %52 = vector.broadcast %51 : vector<8x1xf32> to vector<8x8xf32>
    %53 = arith.mulf %48, %52 : vector<8x8xf32>
    %cst_25 = arith.constant dense<0.000000e+00> : vector<8x8xf32>
    %54 = tpu.matmul %53, %39, %cst_25 {dimension_numbers = #tpu.dot_dimension_numbers<[1], [0], [0], [1], [0, 0, 1, 1], [], []>} : vector<8x8xf32>, vector<8x8xf32>, vector<8x8xf32> -> vector<8x8xf32>
    %55 = vector.extract_strided_slice %9 {offsets = [0, 16], sizes = [8, 8], strides = [1, 1]} : vector<8x32xf32> to vector<8x8xf32>
    %56 = vector.extract_strided_slice %16 {offsets = [0, 16], sizes = [8, 8], strides = [1, 1]} : vector<8x32xf32> to vector<8x8xf32>
    %57 = vector.extract_strided_slice %17 {offsets = [0, 16], sizes = [8, 8], strides = [1, 1]} : vector<8x32xf32> to vector<8x8xf32>
    %cst_26 = arith.constant dense<0.000000e+00> : vector<8x8xf32>
    %58 = tpu.matmul %55, %56, %cst_26 {dimension_numbers = #tpu.dot_dimension_numbers<[1], [1], [0], [0], [0, 0, 1, 0], [], []>} : vector<8x8xf32>, vector<8x8xf32>, vector<8x8xf32> -> vector<8x8xf32>
    %cst_27 = arith.constant 0.353553385 : f32
    %59 = vector.broadcast %cst_27 : f32 to vector<8x8xf32>
    %60 = arith.mulf %58, %59 : vector<8x8xf32>
    %61 = arith.addf %60, %18 : vector<8x8xf32>
    %cst_28 = arith.constant dense<0xFF800000> : vector<8xf32>
    %62 = vector.multi_reduction <maximumf>, %61, %cst_28 [1] : vector<8x8xf32> to vector<8xf32>
    %63 = vector.shape_cast %62 : vector<8xf32> to vector<8x1xf32>
    %64 = vector.broadcast %63 : vector<8x1xf32> to vector<8x8xf32>
    %65 = arith.subf %61, %64 : vector<8x8xf32>
    %66 = math.exp %65 : vector<8x8xf32>
    %cst_29 = arith.constant dense<0.000000e+00> : vector<8xf32>
    %67 = vector.multi_reduction <add>, %66, %cst_29 [1] : vector<8x8xf32> to vector<8xf32>
    %68 = vector.shape_cast %67 : vector<8xf32> to vector<8x1xf32>
    %69 = tpu.reciprocal %68 {approx = true} : vector<8x1xf32> -> vector<8x1xf32>
    %70 = vector.broadcast %69 : vector<8x1xf32> to vector<8x8xf32>
    %71 = arith.mulf %66, %70 : vector<8x8xf32>
    %cst_30 = arith.constant dense<0.000000e+00> : vector<8x8xf32>
    %72 = tpu.matmul %71, %57, %cst_30 {dimension_numbers = #tpu.dot_dimension_numbers<[1], [0], [0], [1], [0, 0, 1, 1], [], []>} : vector<8x8xf32>, vector<8x8xf32>, vector<8x8xf32> -> vector<8x8xf32>
    %73 = vector.extract_strided_slice %9 {offsets = [0, 24], sizes = [8, 8], strides = [1, 1]} : vector<8x32xf32> to vector<8x8xf32>
    %74 = vector.extract_strided_slice %16 {offsets = [0, 24], sizes = [8, 8], strides = [1, 1]} : vector<8x32xf32> to vector<8x8xf32>
    %75 = vector.extract_strided_slice %17 {offsets = [0, 24], sizes = [8, 8], strides = [1, 1]} : vector<8x32xf32> to vector<8x8xf32>
    %cst_31 = arith.constant dense<0.000000e+00> : vector<8x8xf32>
    %76 = tpu.matmul %73, %74, %cst_31 {dimension_numbers = #tpu.dot_dimension_numbers<[1], [1], [0], [0], [0, 0, 1, 0], [], []>} : vector<8x8xf32>, vector<8x8xf32>, vector<8x8xf32> -> vector<8x8xf32>
    %cst_32 = arith.constant 0.353553385 : f32
    %77 = vector.broadcast %cst_32 : f32 to vector<8x8xf32>
    %78 = arith.mulf %76, %77 : vector<8x8xf32>
    %79 = arith.addf %78, %18 : vector<8x8xf32>
    %cst_33 = arith.constant dense<0xFF800000> : vector<8xf32>
    %80 = vector.multi_reduction <maximumf>, %79, %cst_33 [1] : vector<8x8xf32> to vector<8xf32>
    %81 = vector.shape_cast %80 : vector<8xf32> to vector<8x1xf32>
    %82 = vector.broadcast %81 : vector<8x1xf32> to vector<8x8xf32>
    %83 = arith.subf %79, %82 : vector<8x8xf32>
    %84 = math.exp %83 : vector<8x8xf32>
    %cst_34 = arith.constant dense<0.000000e+00> : vector<8xf32>
    %85 = vector.multi_reduction <add>, %84, %cst_34 [1] : vector<8x8xf32> to vector<8xf32>
    %86 = vector.shape_cast %85 : vector<8xf32> to vector<8x1xf32>
    %87 = tpu.reciprocal %86 {approx = true} : vector<8x1xf32> -> vector<8x1xf32>
    %88 = vector.broadcast %87 : vector<8x1xf32> to vector<8x8xf32>
    %89 = arith.mulf %84, %88 : vector<8x8xf32>
    %cst_35 = arith.constant dense<0.000000e+00> : vector<8x8xf32>
    %90 = tpu.matmul %89, %75, %cst_35 {dimension_numbers = #tpu.dot_dimension_numbers<[1], [0], [0], [1], [0, 0, 1, 1], [], []>} : vector<8x8xf32>, vector<8x8xf32>, vector<8x8xf32> -> vector<8x8xf32>
    %91 = tpu.concatenate %36, %54, %72, %90 in 1 : vector<8x8xf32>, vector<8x8xf32>, vector<8x8xf32>, vector<8x8xf32> -> vector<8x32xf32>
    %92 = arith.truncf %91 : vector<8x32xf32> to vector<8x32xbf16>
    %c0_36 = arith.constant 0 : index
    %c0_37 = arith.constant 0 : index
    %93 = vector.load %arg8[%c0_36, %c0_37] : memref<32x32xbf16, #tpu.memory_space<vmem>>, vector<32x32xbf16>
    %cst_38 = arith.constant dense<0.000000e+00> : vector<8x32xf32>
    %94 = tpu.matmul %92, %93, %cst_38 {dimension_numbers = #tpu.dot_dimension_numbers<[1], [0], [0], [1], [0, 0, 1, 1], [], []>} : vector<8x32xbf16>, vector<32x32xbf16>, vector<8x32xf32> -> vector<8x32xf32>
    %c0_39 = arith.constant 0 : index
    %c0_40 = arith.constant 0 : index
    %95 = vector.load %arg9[%c0_39, %c0_40] : memref<1x32xf32, #tpu.memory_space<vmem>>, vector<1x32xf32>
    %96 = vector.broadcast %95 : vector<1x32xf32> to vector<8x32xf32>
    %97 = arith.addf %94, %96 : vector<8x32xf32>
    %98 = arith.addf %1, %97 : vector<8x32xf32>
    %c0_41 = arith.constant 0 : index
    %c0_42 = arith.constant 0 : index
    %99 = vector.load %arg10[%c0_41, %c0_42] : memref<1x32xf32, #tpu.memory_space<vmem>>, vector<1x32xf32>
    %c0_43 = arith.constant 0 : index
    %c0_44 = arith.constant 0 : index
    %100 = vector.load %arg11[%c0_43, %c0_44] : memref<1x32xf32, #tpu.memory_space<vmem>>, vector<1x32xf32>
    %cst_45 = arith.constant dense<0.000000e+00> : vector<8xf32>
    %101 = vector.multi_reduction <add>, %98, %cst_45 [1] : vector<8x32xf32> to vector<8xf32>
    %102 = vector.shape_cast %101 : vector<8xf32> to vector<8x1xf32>
    %cst_46 = arith.constant 3.200000e+01 : f32
    %103 = vector.broadcast %cst_46 : f32 to vector<8x1xf32>
    %104 = arith.divf %102, %103 : vector<8x1xf32>
    %105 = vector.broadcast %104 : vector<8x1xf32> to vector<8x32xf32>
    %106 = arith.subf %98, %105 : vector<8x32xf32>
    %107 = arith.mulf %106, %106 : vector<8x32xf32>
    %cst_47 = arith.constant dense<0.000000e+00> : vector<8xf32>
    %108 = vector.multi_reduction <add>, %107, %cst_47 [1] : vector<8x32xf32> to vector<8xf32>
    %109 = vector.shape_cast %108 : vector<8xf32> to vector<8x1xf32>
    %cst_48 = arith.constant 3.200000e+01 : f32
    %110 = vector.broadcast %cst_48 : f32 to vector<8x1xf32>
    %111 = arith.divf %109, %110 : vector<8x1xf32>
    %cst_49 = arith.constant 9.99999974E-6 : f32
    %112 = vector.broadcast %cst_49 : f32 to vector<8x1xf32>
    %113 = arith.addf %111, %112 : vector<8x1xf32>
    %114 = math.rsqrt %113 : vector<8x1xf32>
    %115 = vector.broadcast %114 : vector<8x1xf32> to vector<8x32xf32>
    %116 = arith.mulf %106, %115 : vector<8x32xf32>
    %117 = vector.broadcast %99 : vector<1x32xf32> to vector<8x32xf32>
    %118 = arith.mulf %116, %117 : vector<8x32xf32>
    %119 = vector.broadcast %100 : vector<1x32xf32> to vector<8x32xf32>
    %120 = arith.addf %118, %119 : vector<8x32xf32>
    %c0_50 = arith.constant 0 : index
    %c0_51 = arith.constant 0 : index
    %c0_52 = arith.constant 0 : index
    %121 = vector.load %arg12[%c0_50, %c0_51, %c0_52] : memref<1x8x32xf32, #tpu.memory_space<vmem>>, vector<1x8x32xf32>
    %122 = vector.shape_cast %121 : vector<1x8x32xf32> to vector<8x32xf32>
    %123 = vector.shape_cast %120 : vector<8x32xf32> to vector<1x8x32xf32>
    tpu.vector_store %arg12[%c0_50, %c0_51, %c0_52], %123 {strides = array<i32>} : memref<1x8x32xf32, #tpu.memory_space<vmem>>, vector<1x8x32xf32>,
    return
  }
  func.func @transform_0(%arg0: i32) -> (i32, i32, i32) {
    %c0_i32 = arith.constant 0 : i32
    %c0_i32_0 = arith.constant 0 : i32
    %c0_i32_1 = arith.constant 0 : i32
    return %arg0, %c0_i32, %c0_i32_0 : i32, i32, i32
  }
  func.func @transform_1(%arg0: i32) -> (i32, i32, i32) {
    %c0_i32 = arith.constant 0 : i32
    %c0_i32_0 = arith.constant 0 : i32
    %c0_i32_1 = arith.constant 0 : i32
    return %arg0, %c0_i32, %c0_i32_0 : i32, i32, i32
  }
  func.func @transform_2(%arg0: i32) -> (i32, i32) {
    %c0_i32 = arith.constant 0 : i32
    %c0_i32_0 = arith.constant 0 : i32
    %c0_i32_1 = arith.constant 0 : i32
    return %c0_i32, %c0_i32_0 : i32, i32
  }
  func.func @transform_3(%arg0: i32) -> (i32, i32) {
    %c0_i32 = arith.constant 0 : i32
    %c0_i32_0 = arith.constant 0 : i32
    %c0_i32_1 = arith.constant 0 : i32
    return %c0_i32, %c0_i32_0 : i32, i32
  }
  func.func @transform_4(%arg0: i32) -> (i32, i32) {
    %c0_i32 = arith.constant 0 : i32
    %c0_i32_0 = arith.constant 0 : i32
    %c0_i32_1 = arith.constant 0 : i32
    return %c0_i32, %c0_i32_0 : i32, i32
  }
  func.func @transform_5(%arg0: i32) -> (i32, i32) {
    %c0_i32 = arith.constant 0 : i32
    %c0_i32_0 = arith.constant 0 : i32
    %c0_i32_1 = arith.constant 0 : i32
    return %c0_i32, %c0_i32_0 : i32, i32
  }
  func.func @transform_6(%arg0: i32) -> (i32, i32) {
    %c0_i32 = arith.constant 0 : i32
    %c0_i32_0 = arith.constant 0 : i32
    %c0_i32_1 = arith.constant 0 : i32
    return %c0_i32, %c0_i32_0 : i32, i32
  }
  func.func @transform_7(%arg0: i32) -> (i32, i32) {
    %c0_i32 = arith.constant 0 : i32
    %c0_i32_0 = arith.constant 0 : i32
    %c0_i32_1 = arith.constant 0 : i32
    return %c0_i32, %c0_i32_0 : i32, i32
  }
  func.func @transform_8(%arg0: i32) -> (i32, i32) {
    %c0_i32 = arith.constant 0 : i32
    %c0_i32_0 = arith.constant 0 : i32
    %c0_i32_1 = arith.constant 0 : i32
    return %c0_i32, %c0_i32_0 : i32, i32
  }
  func.func @transform_9(%arg0: i32) -> (i32, i32) {
    %c0_i32 = arith.constant 0 : i32
    %c0_i32_0 = arith.constant 0 : i32
    %c0_i32_1 = arith.constant 0 : i32
    return %c0_i32, %c0_i32_0 : i32, i32
  }
  func.func @transform_10(%arg0: i32) -> (i32, i32) {
    %c0_i32 = arith.constant 0 : i32
    %c0_i32_0 = arith.constant 0 : i32
    %c0_i32_1 = arith.constant 0 : i32
    return %c0_i32, %c0_i32_0 : i32, i32
  }
  func.func @transform_11(%arg0: i32) -> (i32, i32, i32) {
    %c0_i32 = arith.constant 0 : i32
    %c0_i32_0 = arith.constant 0 : i32
    %c0_i32_1 = arith.constant 0 : i32
    return %arg0, %c0_i32, %c0_i32_0 : i32, i32, i32
  }
}

</mosaic_0001>

<bundles_post_ra>
// kernel: tpu_custom_call.1
= control target key start
LH: loop header
LB: loop body
LE: loop exit
PB: predicated region body
PF: predicated region fallthrough
CT: control target
= control target key end

     0   :  { %s1894_s0 = inlined_call_operand.hbm [shape: f32[2,8,32], index: 0, kind: input, shape index: {}]   ;;  %s1895_s1 = inlined_call_operand.hbm [shape: f32[2,8,32], index: 1, kind: input, shape index: {}]   ;;  %s1896_s2 = inlined_call_operand.hbm [shape: f32[8,8], index: 2, kind: input, shape index: {}]   ;;  %s1897_s3 = inlined_call_operand.hbm [shape: bf16[32,32], index: 3, kind: input, shape index: {}]   ;;  %s1898_s4 = inlined_call_operand.vmem [shape: f32[1,32], index: 4, kind: input, shape index: {}]   ;;  %s1899_s5 = inlined_call_operand.hbm [shape: bf16[32,64], index: 5, kind: input, shape index: {}]   ;;  %s1900_s6 = inlined_call_operand.vmem [shape: f32[1,64], index: 6, kind: input, shape index: {}]   ;;  %s1901_s7 = inlined_call_operand.hbm [shape: bf16[32,32], index: 7, kind: input, shape index: {}]   ;;  %s1902_s8 = inlined_call_operand.vmem [shape: f32[1,32], index: 8, kind: input, shape index: {}]   ;;  %s1903_s9 = inlined_call_operand.vmem [shape: f32[1,32], index: 9, kind: input, shape index: {}]   ;;  %s1904_s10 = inlined_call_operand.vmem [shape: f32[1,32], index: 10, kind: input, shape index: {}]   ;;  %s1905_s11 = inlined_call_operand.hbm [shape: f32[2,8,32], index: 11, kind: output, shape index: {}]  }
   0x1   :  { %1912 = sst [smem:[#allocation26_spill]] %s1896_s2 }
   0x2   :  { %1913 = sst [smem:[#allocation27_spill]] %s1897_s3 }
   0x3   :  { %1914 = sst [smem:[#allocation28_spill]] %s1899_s5 }
   0x4   :  { %1915 = sst [smem:[#allocation29_spill]] %s1901_s7 }
   0x5   :  { %16 = vsyncpa [#allocation3], 0 }
   0x6   :  { %18 = vsyncpa [#allocation3 + $0x1], 0 }
   0x7   :  { %19 = vsyncpa [#allocation6], 0 }
   0x8   :  { %21 = vsyncpa [#allocation6 + $0x1], 0 }
   0x9   :  { %22 = vsyncpa [#allocation9], 0 }
   0xa   :  { %23 = vsyncpa [#allocation12], 0 }
   0xb   :  { %24 = vsyncpa [#allocation4], 0 }
   0xc   :  { %26 = vsyncpa [#allocation4 + $0x1], 0  ;;  %s1634_s17 = smov 0   ;;  %s1636_s18 = smov 0  }
   0xd   :  { %s1638_s19 = smov 0   ;;  %s1640_s20 = smov 0  }
   0xe LB: > { %1916 = sst [smem:[#allocation20_spill]] %s1543_s17  ;;  %s1658_s24 = sadd.s32 4294967295, %s1555_s20   ;;  %s1555_s20 = sphi %s1640_s20, %s1937_s20   ;;  %s1551_s19 = sphi %s1638_s19, %s1939_s19   ;;  %s1547_s18 = sphi %s1636_s18, %s1941_s18   ;;  %s1543_s17 = sphi %s1634_s17, %s1940_s17  }
   0xf   : > { %1917 = sst [smem:[#allocation21_spill]] %s1551_s19  ;;  %p1096_p0 = scmp.ge.s32.totalorder %s1555_s20, 1 }
  0x10   : > { %1918 = sst [smem:[#allocation22_spill]] %s1555_s20  ;;  %p53_p1 = scmp.eq.s32.totalorder %s1658_s24, 0 }
  0x11   : > { %s1919_s2 = sld [smem:[#allocation26_spill]]  ;;  %p304_p2 = scmp.lt.s32.totalorder %s1555_s20, 3 }
  0x12   : > { %s1557_s26 = smov [#allocation7]   ;;  %s1921_s3 = sld [smem:[#allocation27_spill]] }
  0x13   : > { %p1663_p3 = pnand %p1096_p0, %p304_p2  ;;  %s318_s27 = sshll.u32 %s1557_s26, 4  ;;  %s319_s27 = int_to_ptr.vmem [resolvable:$true] %s318_s27 }
  0x14   : > { %s1558_s13 = smov [#allocation8]   ;;  %s1559_s15 = smov 64  }
  0x15   : > { %p1185_p5 = pneg %p1663_p3  ;;  %s329_s14 = sshll.u32 %s1558_s13, 4  ;;  %s330_s14 = int_to_ptr.vmem [resolvable:$true] %s329_s14 }
  0x16   : > { %s1560_s16 = smov 4   ;;  %s1923_s5 = sld [smem:[#allocation28_spill]] }
  0x17   : > { %s316_s23 = sshll.u32 %s1919_s2, 4  ;;  %p1675_p6 = pnand %p1185_p5, %p53_p1  ;;  %s317_s23 = int_to_ptr.hbm [resolvable:$true] %s316_s23 }
  0x18   : > { %s327_s30 = sshll.u32 %s1921_s3, 4  ;;  %s1561_s28 = smov [#allocation10]   ;;  %s328_s30 = int_to_ptr.hbm [resolvable:$true] %s327_s30 }
  0x19   : > { %1188 = dma.hbm_to_vmem [thread:$0]  (!%p1675_p6), %s317_s23, 128, %s319_s27, [#allocation6]  }
  0x1a   : > { %1191 = dma.hbm_to_vmem [thread:$0]  (!%p1675_p6), %s328_s30, 256, %s330_s14, [#allocation9], %s1559_s15, %s1559_s15, %s1560_s16  }
  0x1b   : > { %s346_s29 = sshll.u32 %s1561_s28, 4  ;;  %s1924_s7 = sld [smem:[#allocation29_spill]]  ;;  %s347_s29 = int_to_ptr.vmem [resolvable:$true] %s346_s29 }
  0x1c   : > { %s344_s26 = sshll.u32 %s1923_s5, 4  ;;  %s1562_s30 = smov [#allocation11]   ;;  %s345_s26 = int_to_ptr.hbm [resolvable:$true] %s344_s26 }
  0x1d   : > { %1194 = dma.hbm_to_vmem [thread:$0]  (!%p1675_p6), %s345_s26, 256, %s347_s29, [#allocation9], %s1559_s15, %s1559_s15, %s1560_s16  }
  0x1e   : > { %s363_s14 = sshll.u32 %s1562_s30, 4  ;;  %s1095_s21 = sadd.s32 4294967294, %s1555_s20   ;;  %s364_s14 = int_to_ptr.vmem [resolvable:$true] %s363_s14 }
  0x1f   : > { %s1695_s22 = sadd.s32 1, %s1555_s20   ;;  %s39_s23 = sadd.s32 1, %s1551_s19 }
  0x20   : > { %1925 = sst [smem:[#allocation23_spill]] %s1695_s22  ;;  %s36_s28 = ssub.s32 %s1555_s20, %s1695_s22 }
  0x21   : > { %s361_s13 = sshll.u32 %s1924_s7, 4  ;;  %p37_p7 = scmp.eq.s32.totalorder %s36_s28, 0  ;;  %s362_s13 = int_to_ptr.hbm [resolvable:$true] %s361_s13 }
  0x22   : > { %1197 = dma.hbm_to_vmem [thread:$0]  (!%p1675_p6), %s362_s13, 256, %s364_s14, [#allocation12], %s1559_s15, %s1559_s15, %s1560_s16  }
  0x23   : > { %p46_p8 = scmp.ne.s32.totalorder %s1551_s19, %s1547_s18  ;;  %p47_p9 = scmp.eq.s32.totalorder %s1555_s20, 0 }
  0x24   : > { %p52_p10 = scmp.ne.s32.totalorder %s1547_s18, %s1543_s17  ;;  %p291_p13 = scmp.eq.s32.totalorder %s1658_s24, 1 }
  0x25   : > { %s1706_s26 = scalar_select %p37_p7, %s1551_s19, %s39_s23  }
  0x26   : > { %p1708_p11 = por %p47_p9, %p46_p8  ;;  %p1714_p12 = por %p53_p1, %p52_p10 }
  0x27   : > { %1926 = sst [smem:[#allocation24_spill]] %s1706_s26  ;;  %p297_p0 = scmp.eq.s32.totalorder %s1095_s21, 1 }
  0x28   : > { %p1213_p2 = scmp.lt.s32.totalorder %s1555_s20, 2  ;;  %s386_s15 = sand.u32 1, %s1551_s19  }
  0x29   : > { %p1721_p5 = por %p291_p13, %p46_p8  ;;  %p1725_p6 = por %p297_p0, %p52_p10 }
  0x2a   : > { %s1729_s13 = sshll.u32 %s386_s15, 3  ;;  %s1103_s30 = sshll.u32 %s1555_s20, 3 }
  0x2b   : > { %s1930_s27 = scalar_select %p1725_p6, 1, 0 }
  0x2c   : > { %s394_s23 = scalar_lea.hbm %s1894_s0, %s1103_s30  ;;  %s390_s2 = scalar_lea.vmem [#allocation2], %s1729_s13 }
  0x2d   : > { %1931 = sst [smem:[#allocation25_spill]] %s1930_s27  ;;  %s398_s21 = sshll.u32 %s390_s2, 4  ;;  %s399_s21 = int_to_ptr.vmem [resolvable:$true] %s398_s21 }
  0x2e   : > { %s396_s3 = sshll.u32 %s394_s23, 4  ;;  %p1738_p7 = pnand %p1213_p2, %p1708_p11  ;;  %s397_s3 = int_to_ptr.hbm [resolvable:$true] %s396_s3 }
  0x2f   : > { %s413_s19 = scalar_lea.hbm %s1895_s1, %s1103_s30  ;;  %s405_s22 = sand.u32 1, %s1555_s20  }
  0x30   : > { %s387_s27 = scalar_lea.sflag [#allocation3], %s386_s15  ;;  %s1413_s14 = sshra.s32 %s397_s3, 4  ;;  %s1414_s14 = int_to_ptr.hbm [resolvable:$true] %s1413_s14 }
  0x31   : > { %s1415_s28 = scalar_lea.hbm %s1414_s14, 8  ;;  %p1417_p9 = pneg %p1738_p7 }
  0x32   : > { %p1416_p8 = scmp.ne.s32.totalorder %s1414_s14, %s1415_s28  ;;  %s1420_s23 = scalar_lea.hbm %s1894_s0, 16 }
  0x33   : > { %p1421_p13 = scmp.lt.s32.totalorder %s1414_s14, %s1894_s0  ;;  %p1422_p0 = scmp.lt.s32.totalorder %s1420_s23, %s1415_s28 }
  0x34   : > { %p1418_p10 = pnand %p1417_p9, %p1416_p8 }
  0x35   : > { %p1423_p2 = por %p1422_p0, %p1421_p13 }
  0x36   : > { %p1419_p11 = pneg %p1418_p10 }
  0x38   : > { %p1424_p4 = pnand %p1423_p2, %p1419_p11 }
  0x3a   : > { %1427 = shalt.err (!%p1424_p4)
}
  0x3b   : > { %1201 = dma.hbm_to_vmem [thread:$0]  (!%p1738_p7), %s397_s3, 128, %s399_s21, %s387_s27  }
  0x3c   : > { %s415_s15 = sshll.u32 %s413_s19, 4  ;;  %s409_s30 = scalar_lea.vmem [#allocation5], %s1729_s13  ;;  %s416_s15 = int_to_ptr.hbm [resolvable:$true] %s415_s15 }
  0x3d   : > { %s417_s20 = sshll.u32 %s409_s30, 4  ;;  %s406_s2 = scalar_lea.sflag [#allocation6], %s405_s22  ;;  %s418_s20 = int_to_ptr.vmem [resolvable:$true] %s417_s20 }
  0x3e   : > { %s1443_s29 = sshra.s32 %s416_s15, 4  ;;  %s1450_s23 = scalar_lea.hbm %s1895_s1, 16  ;;  %s1444_s29 = int_to_ptr.hbm [resolvable:$true] %s1443_s29 }
  0x3f   : > { %s1445_s17 = scalar_lea.hbm %s1444_s29, 8  ;;  %p1451_p4 = scmp.lt.s32.totalorder %s1444_s29, %s1895_s1 }
  0x40   : > { %p1446_p8 = scmp.ne.s32.totalorder %s1444_s29, %s1445_s17  ;;  %p1452_p13 = scmp.lt.s32.totalorder %s1450_s23, %s1445_s17 }
  0x42   : > { %p1448_p10 = pnand %p1446_p8, %p1417_p9  ;;  %p1453_p0 = por %p1452_p13, %p1451_p4 }
  0x44   : > { %p1449_p11 = pneg %p1448_p10 }
  0x46   : > { %p1454_p2 = pnand %p1453_p0, %p1449_p11 }
  0x48   : > { %1457 = shalt.err (!%p1454_p2)
}
  0x49   : > { %1204 = dma.hbm_to_vmem [thread:$0]  (!%p1738_p7), %s416_s15, 128, %s418_s20, %s406_s2  }
  0x4a   : > { %426 = sbr.rel (%p1663_p3) target bundleno = 1420 (0x58c), region = 64  ;;  %s1774_s19 = sand.u32 (!%p1663_p3), 1, %s1547_s18  }
  0x4b   : > { %s1777_s22 = sshll.u32 (!%p1663_p3), %s1774_s19, 3  ;;  %s429_s27 = scalar_lea.sflag (!%p1663_p3), [#allocation3], %s1774_s19 }
  0x4c   : > { %s432_s17 = scalar_lea.vmem (!%p1663_p3), [#allocation2], %s1777_s22 }
  0x4f   : > { %1518 = dma.done.wait (%p1714_p12), %s429_s27, 128  }
  0x50   : > { %1520 = vsyncadd (%p1714_p12), %s429_s27, 4294967168  ;;  %s438_s5 = sand.u32 1, %s1658_s24   ;;  %s442_s25 = scalar_lea.vmem [#allocation5], %s1777_s22 }
  0x51   : > { %s439_s20 = scalar_lea.sflag [#allocation6], %s438_s5 }
  0x52   : > { %1522 = dma.done.wait (%p1714_p12), %s439_s20, 128  }
  0x53   : > { %1524 = vsyncadd (%p1714_p12), %s439_s20, 4294967168 }
  0x54   : > { %1526 = dma.done.wait (%p53_p1), [#allocation6], 128  }
  0x55   : > { %1528 = vsyncadd (%p53_p1), [#allocation6], 4294967168 }
  0x56   : > { %1530 = dma.done.wait (%p53_p1), [#allocation9], 512  }
  0x57   : > { %1532 = vsyncadd (%p53_p1), [#allocation9], 4294966784 }
  0x58   : > { %1534 = dma.done.wait (%p53_p1), [#allocation12], 256  }
  0x59   : > { %1536 = vsyncadd (%p53_p1), [#allocation12], 4294967040  ;;  %v1158_v0 = vld [vmem:[#allocation8 + $0x8] sm:$0xff]  ;;  %v1160_v1 = vld [vmem:[#allocation10 + $0x8] sm:$0xff]  ;;  %vm531_vm0 = vcmask 261120   ;;  %vm586_vm1 = vcmask 64512  }
  0x5a   : > { %v1157_v2 = vld [vmem:[#allocation8] sm:$0xff]  ;;  %v1159_v3 = vld [vmem:[#allocation10] sm:$0xff]  ;;  %541 = vmatpush.bf16.msra.mxu0 %v1158_v0  ;;  %578 = vmatpush.bf16.msra.mxu1 %v1160_v1  ;;  %v1269_v8 = vld [vmem:[%s1900_s6] ss:$0 sm:$0xff]  ;;  %s1563_s15 = smov 104   ;;  %s1564_s30 = smov 112  }
  0x5b   : > { %v1803_v4 = vld [vmem:[%s432_s17] sm:$0xff]  ;;  %v509_v5 = vld [vmem:[%s442_s25] sm:$0xff]  ;;  %s1565_s2 = smov 120   ;;  %s1566_s29 = smov 96   ;;  %vm866_vm2 = vcmask 130048   ;;  %vm868_vm3 = vcmask 195584  }
  0x5c   : > { %v510_v6 = vpack.c.bf16 %v1803_v4, %v1803_v4  ;;  %v548_v7 = vpack.c.bf16 %v509_v5, %v509_v5  ;;  %v1268_v9 = vld [vmem:[%s1898_s4] ss:$0 sm:$0xff]  ;;  %s1567_s14 = smov 72   ;;  %s1568_s28 = smov 88  }
  0x5d   : > { %v585_v23 = vld [vmem:[#allocation7] sm:$0xff]  ;;  %s1569_s23 = smov 80   ;;  %s1570_s7 = smov 8  }
  0x5e   : > { %542 = vmatpush.bf16.msra.mxu0 %v1157_v2  ;;  %579 = vmatpush.bf16.msra.mxu1 %v1159_v3  ;;  %s1571_s3 = smov 24   ;;  %s1572_s27 = smov 16  }
  0x5f   : > { %s1154_s20 = sshll.u32 %s1658_s24, 3  ;;  %s506_s24 = scalar_lea.vmem [#allocation13], %s1777_s22 }
  0x60   : > { %s959_s26 = scalar_lea.hbm %s1905_s11, %s1154_s20  ;;  %s1493_s22 = scalar_lea.hbm %s1905_s11, 16 }
  0x61   : > { %1122 = vmatmul.msk.bf16.vlgmr.msra.gmra.mxu0 %vm531_vm0, %v510_v6  ;;  %1131 = vmatmul.msk.bf16.vlgmr.msra.gmra.mxu1 %vm531_vm0, %v548_v7 }
  0xde   : > { %v544_v10 = vpop.f32.mrf.mxu0  ;;  %v581_v11 = vpop.f32.mrf.mxu1 }
  0xdf   : > { %v1815_v12 = vadd.f32 %v1269_v8, %v581_v11  ;;  %v545_v13 = vadd.f32 %v1268_v9, %v544_v10 }
  0xe1   : > { %788 = vrot.lane.b32.xlu2 %v1815_v12, %s1563_s15  ;;  %721 = vrot.lane.b32.xlu1 %v1815_v12, %s1564_s30 }
  0xe2   : > { %654 = vrot.lane.b32.xlu0 %v1815_v12, %s1565_s2  ;;  %1132 = vmatpush.xpose.msk.msra.mxu2 %vm586_vm1, %v1815_v12 }
  0xe5   : > { %1133 = vmatmul.msk.f32.vlgmr.msra.gmra.mxu2 %vm586_vm1, %v545_v13 }
  0xe6   : > { %v546_v14 = vpop.f32.mrf.mxu0  ;;  %v583_v15 = vpop.f32.mrf.mxu1 }
  0xe9   : > { %786 = vrot.lane.b32.xlu2 %v545_v13, %s1563_s15  ;;  %719 = vrot.lane.b32.xlu1 %v545_v13, %s1564_s30 }
  0xea   : > { %652 = vrot.lane.b32.xlu0 %v545_v13, %s1565_s2  ;;  %s961_s2 = sshll.u32 %s506_s24, 4  ;;  %s962_s2 = int_to_ptr.vmem [resolvable:$true] %s961_s2 }
 0x13b   : > { %v789_v16 = vpop.permute.xlu2 %788 }
 0x13c   : > { %1141 = vmatpush.xpose.msk.msrb.mxu0 %vm586_vm1, %v789_v16  ;;  %v1162_v16 = vld [vmem:[#allocation11 + $0x8] sm:$0xff] }
 0x143   : > { %v787_v17 = vpop.permute.xlu2 %786 }
 0x144   : > { %1142 = vmatmul.msk.f32.vlgmr.msrb.gmra.mxu0 %vm586_vm1, %v787_v17  ;;  %v1161_v17 = vld [vmem:[#allocation11] sm:$0xff] }
 0x153   : > { %v722_v18 = vpop.permute.xlu1 %721 }
 0x154   : > { %v655_v19 = vpop.permute.xlu0 %654 }
 0x155   : > { %1135 = vmatpush.xpose.msk.msra.mxu3 %vm586_vm1, %v655_v19 }
 0x159   : > { %1138 = vmatpush.xpose.msk.msrb.mxu3 %vm586_vm1, %v722_v18 }
 0x15b   : > { %v720_v21 = vpop.permute.xlu1 %719 }
 0x15c   : > { %v653_v20 = vpop.permute.xlu0 %652 }
 0x15d   : > { %1136 = vmatmul.msk.f32.vlgmr.msra.gmra.mxu3 %vm586_vm1, %v653_v20 }
 0x15e   : > { %900 = vmatpush.bf16.msra.mxu3 %v1162_v16 }
 0x162   : > { %901 = vmatpush.bf16.msra.mxu3 %v1161_v17 }
 0x165   : > { %1139 = vmatmul.msk.f32.vlgmr.msrb.gmra.mxu3 %vm586_vm1, %v720_v21 }
 0x168   : > { %v610_v22 = vpop.f32.mrf.mxu2 }
 0x169   : > { %v613_v24 = vmul.f32 0.35355338, %v610_v22 }
 0x16b   : > { %v614_v25 = vadd.f32 %v613_v24, %v585_v23 }
 0x16d   : > { %v615_v26 = vsel %vm586_vm1, %v614_v25, -inf }
 0x16e   : > { %616 = vmax.xlane.f32.xlu0 %v615_v26 }
 0x1c1   : > { %v811_v36 = vpop.f32.mrf.mxu0 }
 0x1c2   : > { %v814_v39 = vmul.f32 0.35355338, %v811_v36 }
 0x1c4   : > { %v815_v42 = vadd.f32 %v814_v39, %v585_v23 }
 0x1c6   : > { %v816_v43 = vsel %vm586_vm1, %v815_v42, -inf }
 0x1e0   : > { %v677_v27 = vpop.f32.mrf.mxu3 }
 0x1e1   : > { %v680_v28 = vmul.f32 0.35355338, %v677_v27  ;;  %v617_v29 = vpop.xlane.xlu0 %616 }
 0x1e2   : > { %v618_v30 = vsub.f32 %v614_v25, %v617_v29  ;;  %v1270_v25 = vld [vmem:[%s1902_s8] ss:$0 sm:$0xff] }
 0x1e3   : > { %v681_v31 = vadd.f32 %v680_v28, %v585_v23 }
 0x1e4   : > { %v619_v32 = vmul.f32 1.442695, %v618_v30 }
 0x1e5   : > { %v682_v33 = vsel %vm586_vm1, %v681_v31, -inf }
 0x1e6   : > { %1273 = vpow2.f32 %v619_v32  ;;  %683 = vmax.xlane.f32.xlu1 %v682_v33 }
 0x1e8   : > { %v744_v34 = vpop.f32.mrf.mxu3 }
 0x1e9   : > { %v747_v35 = vmul.f32 0.35355338, %v744_v34 }
 0x1eb   : > { %v748_v37 = vadd.f32 %v747_v35, %v585_v23 }
 0x1ec   : > { %v1274_v38 = vpop.eup %1273 }
 0x1ed   : > { %v749_v40 = vsel %vm586_vm1, %v748_v37, -inf  ;;  %v621_v41 = vsel %vm586_vm1, %v1274_v38, 0.0 }
 0x1ee   : > { %750 = vmax.xlane.f32.xlu2 %v749_v40  ;;  %622 = vadd.xlane.f32.xlu0 %v621_v41 }
 0x1f6   : > { %817 = vmax.xlane.f32.xlu2 %v816_v43 }
 0x20e   : > { %626 = vrot.lane.b32.xlu2 %v1815_v12, %s1566_s29  ;;  %s963_s29 = sshll.u32 %s959_s26, 4  ;;  %s964_s29 = int_to_ptr.hbm [resolvable:$true] %s963_s29 }
 0x216   : > { %827 = vrot.lane.b32.xlu2 %v1815_v12, %s1567_s14  ;;  %s949_s14 = scalar_lea.sflag [#allocation4], %s1774_s19 }
 0x259   : > { %v684_v44 = vpop.xlane.xlu1 %683 }
 0x25a   : > { %v685_v45 = vsub.f32 %v681_v31, %v684_v44  ;;  %v1573_v31 = vmov 32.0  }
 0x25c   : > { %v686_v46 = vmul.f32 1.442695, %v685_v45 }
 0x25e   : > { %1275 = vpow2.f32 %v686_v46 }
 0x261   : > { %v751_v47 = vpop.xlane.xlu2 %750  ;;  %v623_v49 = vpop.xlane.xlu0 %622 }
 0x262   : > { %1277 = vrcp.f32 %v623_v49  ;;  %v752_v53 = vsub.f32 %v748_v37, %v751_v47 }
 0x264   : > { %v1276_v48 = vpop.eup %1275  ;;  %v753_v56 = vmul.f32 1.442695, %v752_v53 }
 0x265   : > { %v688_v50 = vsel %vm586_vm1, %v1276_v48, 0.0 }
 0x266   : > { %689 = vadd.xlane.f32.xlu1 %v688_v50 }
 0x268   : > { %v1278_v55 = vpop.eup %1277 }
 0x269   : > { %v818_v51 = vpop.xlane.xlu2 %817  ;;  %v625_v58 = vmul.f32 %v1278_v55, %v1274_v38 }
 0x26a   : > { %v819_v52 = vsub.f32 %v815_v42, %v818_v51  ;;  %v1271_v51 = vld [vmem:[%s1903_s9] ss:$0 sm:$0xff] }
 0x26c   : > { %v820_v54 = vmul.f32 1.442695, %v819_v52 }
 0x26e   : > { %1279 = vpow2.f32 %v820_v54  ;;  %v1272_v54 = vld [vmem:[%s1904_s10] ss:$0 sm:$0xff] }
 0x26f   : > { %1281 = vpow2.f32 %v753_v56 }
 0x271   : > { %v627_v57 = vpop.permute.xlu2 %626 }
 0x272   : > { %647 = vmatpush.msrb.mxu2 %v627_v57 }
 0x273   : > { %1134 = vmatmul.msk.f32.vlgmr.msrb.gmra.mxu2 %vm586_vm1, %v625_v58 }
 0x274   : > { %v1280_v59 = vpop.eup %1279 }
 0x275   : > { %v822_v60 = vsel %vm586_vm1, %v1280_v59, 0.0  ;;  %v1282_v62 = vpop.eup %1281 }
 0x276   : > { %823 = vadd.xlane.f32.xlu0 %v822_v60  ;;  %v755_v63 = vsel %vm586_vm1, %v1282_v62, 0.0 }
 0x279   : > { %v828_v61 = vpop.permute.xlu2 %827 }
 0x27a   : > { %848 = vmatpush.msrb.mxu1 %v828_v61 }
 0x27e   : > { %756 = vadd.xlane.f32.xlu0 %v755_v63 }
 0x27f   : > { %693 = vrot.lane.b32.xlu1 %v1815_v12, %s1568_s28  ;;  %s1487_s28 = sshra.s32 %s964_s29, 4  ;;  %s1488_s28 = int_to_ptr.hbm [resolvable:$true] %s1487_s28 }
 0x280   : > { %p1494_p7 = scmp.lt.s32.totalorder %s1488_s28, %s1905_s11 }
 0x292   : > { %760 = vrot.lane.b32.xlu0 %v1815_v12, %s1569_s23  ;;  %s1489_s23 = scalar_lea.hbm %s1488_s28, 8 }
 0x293   : > { %p1490_p1 = scmp.ne.s32.totalorder %s1488_s28, %s1489_s23  ;;  %p1495_p9 = scmp.lt.s32.totalorder %s1493_s22, %s1489_s23 }
 0x295   : > { %p1491_p3 = pnand %p1490_p1, %p1721_p5  ;;  %p1496_p8 = por %p1495_p9, %p1494_p7 }
 0x297   : > { %p1492_p12 = pneg %p1491_p3 }
 0x299   : > { %p1497_p10 = pnand %p1496_p8, %p1492_p12 }
 0x2d9   : > { %v690_v0 = vpop.xlane.xlu1 %689 }
 0x2da   : > { %1283 = vrcp.f32 %v690_v0 }
 0x2e0   : > { %v1284_v2 = vpop.eup %1283 }
 0x2e1   : > { %v692_v5 = vmul.f32 %v1284_v2, %v1276_v48 }
 0x2e9   : > { %v824_v1 = vpop.xlane.xlu0 %823 }
 0x2ea   : > { %1285 = vrcp.f32 %v824_v1 }
 0x2f0   : > { %v1286_v3 = vpop.eup %1285 }
 0x2f1   : > { %v694_v6 = vpop.permute.xlu1 %693  ;;  %v826_v7 = vmul.f32 %v1286_v3, %v1280_v59  ;;  %v757_v8 = vpop.xlane.xlu0 %756 }
 0x2f2   : > { %714 = vmatpush.msra.mxu2 %v694_v6  ;;  %1287 = vrcp.f32 %v757_v8 }
 0x2f3   : > { %1137 = vmatmul.msk.f32.vlgmr.msra.gmra.mxu2 %vm586_vm1, %v692_v5  ;;  %1143 = vmatmul.msk.f32.vlgmr.msrb.gmra.mxu1 %vm586_vm1, %v826_v7  ;;  %1289 = vrcp.f32 %v1573_v31 }
 0x2f6   : > { %v649_v12 = vpop.f32.mrf.mxu2 }
 0x2f8   : > { %v1288_v9 = vpop.eup %1287 }
 0x2f9   : > { %v759_v10 = vmul.f32 %v1288_v9, %v1282_v62  ;;  %v1290_v32 = vpop.eup %1289 }
 0x2fa   : > { %v914_v33 = vmul.f32 32.0, %v1290_v32  ;;  %vm918_vm4 = vweird.f32 %v1290_v32 }
 0x2fc   : > { %v915_v34 = vsub.f32 1.0, %v914_v33 }
 0x2fe   : > { %v916_v35 = vmul.f32 %v1290_v32, %v915_v34 }
 0x300   : > { %v917_v36 = vadd.f32 %v1290_v32, %v916_v35 }
 0x302   : > { %v919_v37 = vsel %vm918_vm4, %v1290_v32, %v917_v36 }
 0x304   : > { %v761_v11 = vpop.permute.xlu0 %760 }
 0x305   : > { %781 = vmatpush.msrb.mxu2 %v761_v11 }
 0x306   : > { %1140 = vmatmul.msk.f32.vlgmr.msrb.gmra.mxu2 %vm586_vm1, %v759_v10 }
 0x370   : > { %v850_v14 = vpop.f32.mrf.mxu1 }
 0x376   : > { %v716_v13 = vpop.f32.mrf.mxu2 }
 0x377   : > { %854 = vrot.lane.b32.xlu1 %v716_v13, %s1570_s7 }
 0x37f   : > { %862 = vrot.lane.b32.xlu1 %v850_v14, %s1571_s3 }
 0x389   : > { %v783_v15 = vpop.f32.mrf.mxu2 }
 0x38a   : > { %858 = vrot.lane.b32.xlu2 %v783_v15, %s1572_s27 }
 0x3e4   : > { %v859_v20 = vpop.permute.xlu2 %858 }
 0x3e9   : > { %v855_v18 = vpop.permute.xlu1 %854 }
 0x3ea   : > { %v865_v19 = vsel %vm586_vm1, %v649_v12, %v855_v18 }
 0x3eb   : > { %v867_v22 = vsel %vm866_vm2, %v865_v19, %v859_v20 }
 0x3f1   : > { %v863_v21 = vpop.permute.xlu1 %862 }
 0x3f2   : > { %v869_v23 = vsel %vm868_vm3, %v867_v22, %v863_v21 }
 0x3f3   : > { %v870_v24 = vpack.c.bf16 %v869_v23, %v869_v23 }
 0x3f5   : > { %1152 = vmatmul.msk.bf16.vlgmr.msra.gmra.mxu3 %vm531_vm0, %v870_v24 }
 0x478   : > { %v903_v26 = vpop.f32.mrf.mxu3 }
 0x479   : > { %v904_v27 = vadd.f32 %v1270_v25, %v903_v26 }
 0x47b   : > { %v907_v28 = vadd.f32 %v904_v27, %v1803_v4 }
 0x47d   : > { %v910_v29 = vsel %vm531_vm0, %v907_v28, 0.0 }
 0x47e   : > { %911 = vadd.xlane.f32.xlu0 %v910_v29 }
 0x480   : > { %v905_v30 = vpop.f32.mrf.mxu3 }
 0x4f1   : > { %v912_v38 = vpop.xlane.xlu0 %911 }
 0x4f2   : > { %v920_v39 = vmul.f32 %v919_v37, %v912_v38 }
 0x4f4   : > { %v921_v40 = vsub.f32 %v907_v28, %v920_v39 }
 0x4f6   : > { %v922_v41 = vmul.f32 %v921_v40, %v921_v40 }
 0x4f8   : > { %v923_v4 = vsel %vm531_vm0, %v922_v41, 0.0 }
 0x4f9   : > { %924 = vadd.xlane.f32.xlu2 %v923_v4 }
 0x56c   : > { %v925_v42 = vpop.xlane.xlu2 %924 }
 0x56d   : > { %v926_v43 = vmul.f32 %v925_v42, %v919_v37 }
 0x56f   : > { %v927_v44 = vadd.f32 1e-05, %v926_v43 }
 0x571   : > { %1291 = vrsqrt.f32 %v927_v44  ;;  %vm934_vm6 = vweird.f32 %v927_v44 }
 0x577   : > { %v1292_v45 = vpop.eup %1291 }
 0x578   : > { %v929_v46 = vmul.f32 %v1292_v45, %v927_v44  ;;  %vm935_vm5 = vweird.f32 %v1292_v45 }
 0x579   : > { %vm936_vm7 = vmor %vm934_vm6, %vm935_vm5 }
 0x57a   : > { %v930_v47 = vmul.f32 %v1292_v45, %v929_v46 }
 0x57c   : > { %v931_v48 = vmul.f32 0.5, %v930_v47 }
 0x57e   : > { %v932_v49 = vsub.f32 1.5, %v931_v48 }
 0x580   : > { %v933_v50 = vmul.f32 %v1292_v45, %v932_v49 }
 0x582   : > { %v937_v52 = vsel %vm936_vm7, %v1292_v45, %v933_v50 }
 0x583   : > { %v938_v53 = vmul.f32 %v937_v52, %v921_v40 }
 0x585   : > { %v942_v55 = vmul.f32 %v1271_v51, %v938_v53 }
 0x587   : > { %v946_v56 = vadd.f32 %v1272_v54, %v942_v55 }
 0x589   : > { %947 = vst.msk [vmem:[%s506_s24] sm:$0xff] %vm531_vm0, %v946_v56 }
 0x58a   : > { %1500 = shalt.err (!%p1497_p10)
}
 0x58b   : > { %1183 = dma.vmem_to_hbm [thread:$0]  (%p1721_p5), %s962_s2, 128, %s964_s29, %s949_s14  }
 0x58c PF: > { %s1933_s19 = sld [smem:[#allocation20_spill]] }
 0x58d   : > { %s1935_s20 = sld [smem:[#allocation22_spill]] }
 0x592   : > { %s975_s25 = sand.u32 1, %s1933_s19  }
 0x593   : > { %p1936_p11 = scmp.ge.s32.totalorder %s1935_s20, 2  ;;  %s976_s12 = scalar_lea.sflag [#allocation4], %s975_s25 }
 0x595   : > { %p1206_p4 = pnand %p1936_p11, %p1725_p6 }
 0x597   : > { %p1207_p13 = pneg %p1206_p4 }
 0x599   : > { %1538 = dma.done.wait (%p1207_p13), %s976_s12, 128  }
 0x59a   : > { %1540 = vsyncadd (%p1207_p13), %s976_s12, 4294967168  ;;  %s1937_s20 = sld [smem:[#allocation23_spill]]  ;;  %s1940_s17 = smov %s1547_s18 }
 0x59b   : > { %s1938_s13 = sld [smem:[#allocation21_spill]] }
 0x59c   : > { %s1939_s19 = sld [smem:[#allocation24_spill]] }
 0x5a0   : > { %p29_p0 = scmp.ge.s32.totalorder %s1937_s20, 4  }
 0x5a1   : > { %s1941_s18 = smov %s1938_s13 }
 0x5a2   :  { %31 = sbr.rel (!%p29_p0) target bundleno = 14 (0xe), region = 138 }
 0x5a7   :  { %982 = vsyncpa [#allocation3], 1 }
 0x5a8   :  { %984 = vsyncpa [#allocation3 + $0x1], 1 }
 0x5a9   :  { %985 = vsyncpa [#allocation6], 1 }
 0x5aa   :  { %987 = vsyncpa [#allocation6 + $0x1], 1 }
 0x5ab   :  { %988 = vsyncpa [#allocation9], 1 }
 0x5ac   :  { %989 = vsyncpa [#allocation12], 1 }
 0x5ad   :  { %990 = vsyncpa [#allocation4], 1 }
 0x5ae   :  { %992 = vsyncpa [#allocation4 + $0x1], 1 }

</bundles_post_ra>
